<compile_context>
chip_gen: v5e
topology: v5e:2x2
jax: 0.10.0
libtpu: 0.0.40
codegen_flags: <defaults>
</compile_context>

<pallas_src>
import functools

import jax
import jax.numpy as jnp
from jax import lax
from jax.experimental import pallas as pl
from jax.experimental.pallas import tpu as pltpu

_LANES = 128
_SUB = 8


def _giou_from_boxes(b, eps):
    """b: (8, bn, 128) f32 -> per-box GIoU loss (bn, 128) f32."""
    px1, py1, px2, py2 = b[0], b[1], b[2], b[3]
    tx1, ty1, tx2, ty2 = b[4], b[5], b[6], b[7]

    area_p = (px2 - px1) * (py2 - py1)
    area_t = (tx2 - tx1) * (ty2 - ty1)

    iw = jnp.maximum(jnp.minimum(px2, tx2) - jnp.maximum(px1, tx1), 0.0)
    ih = jnp.maximum(jnp.minimum(py2, ty2) - jnp.maximum(py1, ty1), 0.0)
    overlap = iw * ih

    union = jnp.maximum(area_p + area_t - overlap, eps)
    ious = overlap / union

    ew = jnp.maximum(jnp.maximum(px2, tx2) - jnp.minimum(px1, tx1), 0.0)
    eh = jnp.maximum(jnp.maximum(py2, ty2) - jnp.minimum(py1, ty1), 0.0)
    enclose = jnp.maximum(ew * eh, eps)

    gious = ious - (enclose - union) / enclose
    return 1.0 - gious


# ---- reduce kernels (mean / sum): one SMEM partial sum per grid block ----

def _giou_sum_kernel(boxes_ref, psum_ref, *, eps, n, bn):
    loss = _giou_from_boxes(boxes_ref[...], eps)
    row = lax.broadcasted_iota(jnp.int32, (bn, _LANES), 0)
    lane = lax.broadcasted_iota(jnp.int32, (bn, _LANES), 1)
    idx = (pl.program_id(0) * bn + row) * _LANES + lane
    mask = (idx < n).astype(jnp.float32)
    psum_ref[0, 0] = jnp.sum(loss * mask)


def _giou_sum_w_kernel(boxes_ref, w_ref, psum_ref, *, eps):
    loss = _giou_from_boxes(boxes_ref[...], eps)
    psum_ref[0, 0] = jnp.sum(loss * w_ref[...])  # padded lanes carry w == 0


# ---- 'none' kernels: dense per-box loss block, no sum output ----

def _giou_none_kernel(boxes_ref, loss_ref, *, eps):
    loss_ref[...] = _giou_from_boxes(boxes_ref[...], eps)


def _giou_none_w_kernel(boxes_ref, w_ref, loss_ref, *, eps):
    loss_ref[...] = _giou_from_boxes(boxes_ref[...], eps) * w_ref[...]


def giou_loss_pallas(pred, target, weight=None, eps=1e-6, reduction="mean",
                     loss_weight=1.0, avg_factor=None, block_rows=64):
    """JAX/Pallas equivalent of GIoULoss.forward.

    pred, target: (n, 4) arrays of (x1, y1, x2, y2).
    block_rows: sublane-rows of 128 boxes per grid step (rounded to multiple of 8).
    """
    assert pred.shape == target.shape and pred.shape[-1] == 4
    assert reduction in ("none", "mean", "sum")
    n = int(pred.shape[0])

    block_rows = max(_SUB, (int(block_rows) // _SUB) * _SUB)
    rows = max(1, -(-n // _LANES))                 # sublane-rows of 128 boxes
    rows = -(-rows // _SUB) * _SUB                 # round up to multiple of 8
    bn = min(block_rows, rows)                     # rows per block
    m_rows = -(-rows // bn) * bn                   # total rows, multiple of bn
    npad = m_rows * _LANES
    grid = (m_rows // bn,)

    pred_f = jnp.asarray(pred, jnp.float32)
    target_f = jnp.asarray(target, jnp.float32)

    # Single fused pad + transpose + reshape into the (8, M, 128) kernel layout.
    boxes = jnp.concatenate([pred_f, target_f], axis=1)          # (n, 8)
    boxes = jnp.pad(boxes, ((0, npad - n), (0, 0)))               # (npad, 8)
    boxes = boxes.T.reshape(8, m_rows, _LANES)                    # (8, M, 128)

    boxes_spec = pl.BlockSpec((8, bn, _LANES), lambda i: (0, i, 0))
    w_spec = pl.BlockSpec((bn, _LANES), lambda i: (i, 0))
    loss_spec = pl.BlockSpec((bn, _LANES), lambda i: (i, 0))
    psum_spec = pl.BlockSpec((1, 1), lambda i: (i, 0), memory_space=pltpu.SMEM)
    compiler_params = pltpu.CompilerParams(dimension_semantics=("parallel",))

    w_pad = None
    if weight is not None:
        w_raw = jnp.asarray(weight, jnp.float32)
        w_vec = w_raw.mean(-1) if w_raw.ndim > 1 else w_raw       # weight.mean(-1)
        w_pad = jnp.pad(w_vec, (0, npad - n)).reshape(m_rows, _LANES)

    in_bytes = boxes.size * 4 + (w_pad.size * 4 if w_pad is not None else 0)

    if reduction == "none":
        out_shape = jax.ShapeDtypeStruct((m_rows, _LANES), jnp.float32)
        cost = pl.CostEstimate(flops=32 * npad, transcendentals=0,
                               bytes_accessed=in_bytes + npad * 4)
        if weight is None:
            per_box = pl.pallas_call(
                functools.partial(_giou_none_kernel, eps=float(eps)),
                grid=grid, in_specs=[boxes_spec], out_specs=loss_spec,
                out_shape=out_shape, compiler_params=compiler_params,
                cost_estimate=cost,
            )(boxes)
        else:
            per_box = pl.pallas_call(
                functools.partial(_giou_none_w_kernel, eps=float(eps)),
                grid=grid, in_specs=[boxes_spec, w_spec], out_specs=loss_spec,
                out_shape=out_shape, compiler_params=compiler_params,
                cost_estimate=cost,
            )(boxes, w_pad)
        # TODO(synk): the torch early-return branch `(pred * weight).sum()` when no
        # weight is positive changes the output shape and is not reproduced for
        # reduction='none'.
        return loss_weight * per_box.reshape(npad)[:n]

    # 'mean' or 'sum': only per-block partial sums are written back.
    psum_shape = jax.ShapeDtypeStruct((grid[0], 1), jnp.float32)
    cost = pl.CostEstimate(flops=32 * npad, transcendentals=0,
                           bytes_accessed=in_bytes + grid[0] * 4)
    if weight is None:
        psums = pl.pallas_call(
            functools.partial(_giou_sum_kernel, eps=float(eps), n=n, bn=bn),
            grid=grid, in_specs=[boxes_spec], out_specs=psum_spec,
            out_shape=psum_shape, compiler_params=compiler_params,
            cost_estimate=cost,
        )(boxes)
    else:
        psums = pl.pallas_call(
            functools.partial(_giou_sum_w_kernel, eps=float(eps)),
            grid=grid, in_specs=[boxes_spec, w_spec], out_specs=psum_spec,
            out_shape=psum_shape, compiler_params=compiler_params,
            cost_estimate=cost,
        )(boxes, w_pad)

    total = jnp.sum(psums)
    if reduction == "mean":
        denom = jnp.float32(n) if avg_factor is None else jnp.float32(avg_factor)
        result = total / denom
    else:
        result = total
    result = loss_weight * result

    if weight is not None:
        # torch early-return: if not any(weight > 0) -> (pred * weight).sum()
        w_raw = jnp.asarray(weight, jnp.float32)
        w_e = w_raw
        if pred_f.ndim == w_e.ndim + 1:
            w_e = jnp.expand_dims(w_e, 1)
        early = jnp.sum(pred_f * w_e)
        result = jnp.where(jnp.any(w_raw > 0), result, early)
    return result


def _giou_loss_ref(pred, target, eps=1e-6):
    """Pure-JAX reference (mirrors mmcv bbox_overlaps giou, is_aligned=True)."""
    area_p = (pred[:, 2] - pred[:, 0]) * (pred[:, 3] - pred[:, 1])
    area_t = (target[:, 2] - target[:, 0]) * (target[:, 3] - target[:, 1])
    lt = jnp.maximum(pred[:, :2], target[:, :2])
    rb = jnp.minimum(pred[:, 2:], target[:, 2:])
    wh = jnp.clip(rb - lt, 0.0)
    overlap = wh[:, 0] * wh[:, 1]
    union = jnp.maximum(area_p + area_t - overlap, eps)
    ious = overlap / union
    elt = jnp.minimum(pred[:, :2], target[:, :2])
    erb = jnp.maximum(pred[:, 2:], target[:, 2:])
    ewh = jnp.clip(erb - elt, 0.0)
    enclose = jnp.maximum(ewh[:, 0] * ewh[:, 1], eps)
    gious = ious - (enclose - union) / enclose
    return 1.0 - gious


if __name__ == "__main__":
    key = jax.random.PRNGKey(0)
    ks = jax.random.split(key, 9)

    def make_boxes(ka, kb, n):
        xy = jax.random.uniform(ka, (n, 2), jnp.float32, 0.0, 10.0)
        wh = jax.random.uniform(kb, (n, 2), jnp.float32, 0.5, 5.0)
        return jnp.concatenate([xy, xy + wh], axis=-1)

    # --- test 1: small n (single block), module defaults (mean, weight=None) ---
    n1 = 13
    pred1 = make_boxes(ks[0], ks[1], n1)
    tgt1 = make_boxes(ks[2], ks[3], n1)
    out1 = jax.block_until_ready(giou_loss_pallas(pred1, tgt1))
    ref1 = jnp.mean(_giou_loss_ref(pred1, tgt1, eps=1e-6))
    assert jnp.allclose(out1, ref1, rtol=1e-4, atol=1e-5), (out1, ref1)

    # --- test 2: multi-block grid (block_rows=8 -> grid of 2), all reductions ---
    n2 = 2000
    pred2 = make_boxes(ks[4], ks[5], n2)
    tgt2 = make_boxes(ks[6], ks[7], n2)
    ref_per_box = _giou_loss_ref(pred2, tgt2, eps=1e-6)

    out2 = jax.block_until_ready(
        giou_loss_pallas(pred2, tgt2, reduction="mean", block_rows=8))
    assert jnp.allclose(out2, jnp.mean(ref_per_box), rtol=1e-4, atol=1e-5), out2

    out3 = jax.block_until_ready(
        giou_loss_pallas(pred2, tgt2, reduction="none", block_rows=8))
    assert out3.shape == (n2,)
    assert jnp.allclose(out3, ref_per_box, rtol=1e-4, atol=1e-5)

    w2 = jax.random.uniform(ks[8], (n2,), jnp.float32, 0.5, 1.5)
    out4 = jax.block_until_ready(
        giou_loss_pallas(pred2, tgt2, weight=w2, reduction="mean", block_rows=8))
    ref4 = jnp.sum(ref_per_box * w2) / n2
    assert jnp.allclose(out4, ref4, rtol=1e-4, atol=1e-5), (out4, ref4)

    print("KERNEL_OK")
</pallas_src>

<mosaic_0001>
module attributes {stable_mosaic.version = 11 : i64} {
  func.func @_giou_sum_kernel(%arg0: i32, %arg1: memref<8x8x128xf32, #tpu.memory_space<vmem>>, %arg2: memref<1x1xf32, #tpu.memory_space<smem>>) attributes {dimension_semantics = [#tpu.dimension_semantics<parallel>], iteration_bounds = array<i64: 1>, scalar_prefetch = 0 : i64, scratch_operands = 0 : i64, tpu.core_type = #tpu.core_type<tc>, window_params = [{transform_indices = @transform_0, window_bounds = array<i64: 8, 8, 128>}, {transform_indices = @transform_1, window_bounds = array<i64: 1, 1>}]} {
    %c0 = arith.constant 0 : index
    %c0_0 = arith.constant 0 : index
    %c0_1 = arith.constant 0 : index
    %0 = vector.load %arg1[%c0, %c0_0, %c0_1] : memref<8x8x128xf32, #tpu.memory_space<vmem>>, vector<8x8x128xf32>
    %1 = vector.extract_strided_slice %0 {offsets = [0, 0, 0], sizes = [1, 8, 128], strides = [1, 1, 1]} : vector<8x8x128xf32> to vector<1x8x128xf32>
    %2 = vector.shape_cast %1 : vector<1x8x128xf32> to vector<8x128xf32>
    %3 = vector.extract_strided_slice %0 {offsets = [1, 0, 0], sizes = [1, 8, 128], strides = [1, 1, 1]} : vector<8x8x128xf32> to vector<1x8x128xf32>
    %4 = vector.shape_cast %3 : vector<1x8x128xf32> to vector<8x128xf32>
    %5 = vector.extract_strided_slice %0 {offsets = [2, 0, 0], sizes = [1, 8, 128], strides = [1, 1, 1]} : vector<8x8x128xf32> to vector<1x8x128xf32>
    %6 = vector.shape_cast %5 : vector<1x8x128xf32> to vector<8x128xf32>
    %7 = vector.extract_strided_slice %0 {offsets = [3, 0, 0], sizes = [1, 8, 128], strides = [1, 1, 1]} : vector<8x8x128xf32> to vector<1x8x128xf32>
    %8 = vector.shape_cast %7 : vector<1x8x128xf32> to vector<8x128xf32>
    %9 = vector.extract_strided_slice %0 {offsets = [4, 0, 0], sizes = [1, 8, 128], strides = [1, 1, 1]} : vector<8x8x128xf32> to vector<1x8x128xf32>
    %10 = vector.shape_cast %9 : vector<1x8x128xf32> to vector<8x128xf32>
    %11 = vector.extract_strided_slice %0 {offsets = [5, 0, 0], sizes = [1, 8, 128], strides = [1, 1, 1]} : vector<8x8x128xf32> to vector<1x8x128xf32>
    %12 = vector.shape_cast %11 : vector<1x8x128xf32> to vector<8x128xf32>
    %13 = vector.extract_strided_slice %0 {offsets = [6, 0, 0], sizes = [1, 8, 128], strides = [1, 1, 1]} : vector<8x8x128xf32> to vector<1x8x128xf32>
    %14 = vector.shape_cast %13 : vector<1x8x128xf32> to vector<8x128xf32>
    %15 = vector.extract_strided_slice %0 {offsets = [7, 0, 0], sizes = [1, 8, 128], strides = [1, 1, 1]} : vector<8x8x128xf32> to vector<1x8x128xf32>
    %16 = vector.shape_cast %15 : vector<1x8x128xf32> to vector<8x128xf32>
    %17 = arith.subf %6, %2 : vector<8x128xf32>
    %18 = arith.subf %8, %4 : vector<8x128xf32>
    %19 = arith.mulf %17, %18 : vector<8x128xf32>
    %20 = arith.subf %14, %10 : vector<8x128xf32>
    %21 = arith.subf %16, %12 : vector<8x128xf32>
    %22 = arith.mulf %20, %21 : vector<8x128xf32>
    %23 = arith.minimumf %6, %14 : vector<8x128xf32>
    %24 = arith.maximumf %2, %10 : vector<8x128xf32>
    %25 = arith.subf %23, %24 : vector<8x128xf32>
    %cst = arith.constant 0.000000e+00 : f32
    %26 = vector.broadcast %cst : f32 to vector<8x128xf32>
    %27 = arith.maximumf %25, %26 : vector<8x128xf32>
    %28 = arith.minimumf %8, %16 : vector<8x128xf32>
    %29 = arith.maximumf %4, %12 : vector<8x128xf32>
    %30 = arith.subf %28, %29 : vector<8x128xf32>
    %cst_2 = arith.constant 0.000000e+00 : f32
    %31 = vector.broadcast %cst_2 : f32 to vector<8x128xf32>
    %32 = arith.maximumf %30, %31 : vector<8x128xf32>
    %33 = arith.mulf %27, %32 : vector<8x128xf32>
    %34 = arith.addf %19, %22 : vector<8x128xf32>
    %35 = arith.subf %34, %33 : vector<8x128xf32>
    %cst_3 = arith.constant 9.99999997E-7 : f32
    %36 = vector.broadcast %cst_3 : f32 to vector<8x128xf32>
    %37 = arith.maximumf %35, %36 : vector<8x128xf32>
    %38 = arith.divf %33, %37 : vector<8x128xf32>
    %39 = arith.maximumf %6, %14 : vector<8x128xf32>
    %40 = arith.minimumf %2, %10 : vector<8x128xf32>
    %41 = arith.subf %39, %40 : vector<8x128xf32>
    %cst_4 = arith.constant 0.000000e+00 : f32
    %42 = vector.broadcast %cst_4 : f32 to vector<8x128xf32>
    %43 = arith.maximumf %41, %42 : vector<8x128xf32>
    %44 = arith.maximumf %8, %16 : vector<8x128xf32>
    %45 = arith.minimumf %4, %12 : vector<8x128xf32>
    %46 = arith.subf %44, %45 : vector<8x128xf32>
    %cst_5 = arith.constant 0.000000e+00 : f32
    %47 = vector.broadcast %cst_5 : f32 to vector<8x128xf32>
    %48 = arith.maximumf %46, %47 : vector<8x128xf32>
    %49 = arith.mulf %43, %48 : vector<8x128xf32>
    %cst_6 = arith.constant 9.99999997E-7 : f32
    %50 = vector.broadcast %cst_6 : f32 to vector<8x128xf32>
    %51 = arith.maximumf %49, %50 : vector<8x128xf32>
    %52 = arith.subf %51, %37 : vector<8x128xf32>
    %53 = arith.divf %52, %51 : vector<8x128xf32>
    %54 = arith.subf %38, %53 : vector<8x128xf32>
    %cst_7 = arith.constant 1.000000e+00 : f32
    %55 = vector.broadcast %cst_7 : f32 to vector<8x128xf32>
    %56 = arith.subf %55, %54 : vector<8x128xf32>
    %57 = tpu.iota {dimensions = array<i32: 0>} : vector<8x128xi32>
    %58 = tpu.iota {dimensions = array<i32: 1>} : vector<8x128xi32>
    %c8_i32 = arith.constant 8 : i32
    %59 = arith.muli %arg0, %c8_i32 : i32
    %60 = vector.broadcast %59 : i32 to vector<8x128xi32>
    %61 = arith.addi %60, %57 : vector<8x128xi32>
    %c128_i32 = arith.constant 128 : i32
    %62 = vector.broadcast %c128_i32 : i32 to vector<8x128xi32>
    %63 = arith.muli %61, %62 : vector<8x128xi32>
    %64 = arith.addi %63, %58 : vector<8x128xi32>
    %c13_i32 = arith.constant 13 : i32
    %65 = vector.broadcast %c13_i32 : i32 to vector<8x128xi32>
    %66 = arith.cmpi slt, %64, %65 : vector<8x128xi32>
    %67 = arith.extui %66 : vector<8x128xi1> to vector<8x128xi32>
    %68 = arith.sitofp %67 : vector<8x128xi32> to vector<8x128xf32>
    %69 = arith.mulf %56, %68 : vector<8x128xf32>
    %70 = vector.shape_cast %69 : vector<8x128xf32> to vector<1x8x128xf32>
    %cst_8 = arith.constant dense<0.000000e+00> : vector<1xf32>
    %71 = vector.multi_reduction <add>, %70, %cst_8 [1, 2] : vector<1x8x128xf32> to vector<1xf32>
    %72 = vector.shape_cast %71 : vector<1xf32> to vector<1x1x1xf32>
    %73 = vector.extract %72[0, 0, 0] : f32 from vector<1x1x1xf32>
    %c0_9 = arith.constant 0 : index
    %c0_10 = arith.constant 0 : index
    %74 = memref.load %arg2[%c0_9, %c0_10] : memref<1x1xf32, #tpu.memory_space<smem>>
    memref.store %73, %arg2[%c0_9, %c0_10] : memref<1x1xf32, #tpu.memory_space<smem>>
    return
  }
  func.func @transform_0(%arg0: i32) -> (i32, i32, i32) {
    %c0_i32 = arith.constant 0 : i32
    %c0_i32_0 = arith.constant 0 : i32
    %c0_i32_1 = arith.constant 0 : i32
    return %c0_i32, %arg0, %c0_i32_0 : i32, i32, i32
  }
  func.func @transform_1(%arg0: i32) -> (i32, i32) {
    %c0_i32 = arith.constant 0 : i32
    %c0_i32_0 = arith.constant 0 : i32
    return %arg0, %c0_i32 : i32, i32
  }
}

</mosaic_0001>

<bundles_post_ra>
// kernel: tpu_custom_call.1
= control target key start
LH: loop header
LB: loop body
LE: loop exit
PB: predicated region body
PF: predicated region fallthrough
CT: control target
= control target key end

     0   :  { %6 = vsyncpa [#allocation3], 0  ;;  %s207_s0 = inlined_call_operand.hbm [shape: f32[8,8,128], index: 0, kind: input, shape index: {}]   ;;  %s208_s1 = inlined_call_operand.hbm [shape: f32[1,1], index: 1, kind: output, shape index: {}]  }
   0x1   :  { %7 = vsyncpa [#allocation4], 0  ;;  %s12_s8 = sshll.u32 %s207_s0, 4  ;;  %s186_s9 = smov [#allocation2]   ;;  %s13_s8 = int_to_ptr.hbm [resolvable:$true] %s12_s8 }
   0x2   :  { %s14_s10 = sshll.u32 %s186_s9, 4  ;;  %s187_s11 = smov 128   ;;  %s15_s10 = int_to_ptr.vmem [resolvable:$true] %s14_s10 }
   0x3   :  { %s188_s12 = smov 8  }
   0x4   :  { %20 = dma.hbm_to_vmem [thread:$0]  %s13_s8, 1024, %s15_s10, [#allocation3], %s187_s11, %s187_s11, %s188_s12  }
   0x5   :  { %182 = dma.done.wait [#allocation3], 1024  }
   0x6   :  { %183 = vsyncadd [#allocation3], 4294966272  ;;  %v25_v0 = vld [vmem:[#allocation2] sm:$0xff]  ;;  %v26_v1 = vld [vmem:[#allocation2 + $0x8] sm:$0xff]  ;;  %v94_v36 = vlaneseq  ;;  %s123_s14 = sshll.u32 %s208_s1, 4  ;;  %s190_s16 = smov [#allocation5]   ;;  %s124_s14 = int_to_ptr.hbm [resolvable:$true] %s123_s14 }
   0x7   :  { %v27_v2 = vld [vmem:[#allocation2 + $0x10] sm:$0xff]  ;;  %v28_v3 = vld [vmem:[#allocation2 + $0x18] sm:$0xff]  ;;  %v29_v4 = vld [vmem:[#allocation2 + $0x20] sm:$0xff] }
   0x8   :  { %v30_v5 = vld [vmem:[#allocation2 + $0x28] sm:$0xff]  ;;  %v33_v6 = vsub.f32 %v27_v2, %v25_v0  ;;  %v31_v7 = vld [vmem:[#allocation2 + $0x30] sm:$0xff]  ;;  %v32_v8 = vld [vmem:[#allocation2 + $0x38] sm:$0xff]  ;;  %v34_v9 = vsub.f32 %v28_v3, %v26_v1  ;;  %v40_v10 = vmax.f32 %v25_v0, %v29_v4  ;;  %v67_v12 = vmin.f32 %v25_v0, %v29_v4 }
   0x9   :  { %v44_v11 = vmax.f32 %v26_v1, %v30_v5  ;;  %v36_v13 = vsub.f32 %v31_v7, %v29_v4  ;;  %v37_v14 = vsub.f32 %v32_v8, %v30_v5  ;;  %v39_v15 = vmin.f32 %v27_v2, %v31_v7 }
   0xa   :  { %v43_v16 = vmin.f32 %v28_v3, %v32_v8  ;;  %v35_v17 = vmul.f32 %v34_v9, %v33_v6  ;;  %v66_v18 = vmax.f32 %v27_v2, %v31_v7  ;;  %v70_v19 = vmax.f32 %v28_v3, %v32_v8 }
   0xb   :  { %v71_v20 = vmin.f32 %v26_v1, %v30_v5  ;;  %v38_v21 = vmul.f32 %v37_v14, %v36_v13  ;;  %v41_v22 = vsub.f32 %v39_v15, %v40_v10  ;;  %v95_v37 = vshrl.u32 %v94_v36, 7 }
   0xc   :  { %v45_v23 = vsub.f32 %v43_v16, %v44_v11  ;;  %v68_v24 = vsub.f32 %v66_v18, %v67_v12  ;;  %v97_v41 = vand.u32 127, %v94_v36  ;;  %v189_v1 = vmov 0.0  }
   0xd   :  { %v72_v25 = vsub.f32 %v70_v19, %v71_v20  ;;  %v42_v26 = vmax.f32 %v41_v22, 0.0  ;;  %v48_v28 = vadd.f32 %v38_v21, %v35_v17  ;;  %v101_v44 = vmul.u32 128, %v95_v37 }
   0xe   :  { %v46_v27 = vmax.f32 %v45_v23, 0.0  ;;  %v69_v29 = vmax.f32 %v68_v24, 0.0 }
   0xf   :  { %v73_v30 = vmax.f32 %v72_v25, 0.0  ;;  %v102_v57 = vadd.s32 %v101_v44, %v97_v41 }
  0x10   :  { %v47_v31 = vmul.f32 %v46_v27, %v42_v26 }
  0x11   :  { %v74_v32 = vmul.f32 %v73_v30, %v69_v29  ;;  %vm103_vm8 = vcmp.lt.s32.totalorder %v102_v57, 13 }
  0x12   :  { %v49_v33 = vsub.f32 %v48_v28, %v47_v31  ;;  %v134_v2 = vsel %vm103_vm8, 1.0, %v189_v1 }
  0x13   :  { %v75_v34 = vmax.f32 %v74_v32, 1e-06 }
  0x14   :  { %v50_v35 = vmax.f32 %v49_v33, 1e-06 }
  0x15   :  { %142 = vrcp.f32 %v75_v34  ;;  %vm82_vm0 = vweird.f32 %v75_v34  ;;  %v88_v43 = vand.u32 2147483648, %v75_v34  ;;  %v86_v47 = vand.u32 2147483647, %v75_v34 }
  0x16   :  { %144 = vrcp.f32 %v50_v35  ;;  %v62_v45 = vand.u32 2147483648, %v50_v35  ;;  %vm56_vm2 = vweird.f32 %v50_v35  ;;  %v60_v49 = vand.u32 2147483647, %v50_v35 }
  0x17   :  { %v89_v52 = vor.u32 1.1754944e-38, %v88_v43  ;;  %v76_v54 = vsub.f32 %v75_v34, %v50_v35  ;;  %vm87_vm6 = vcmp.eq.f32.partialorder %v86_v47, 8.507059e+37 }
  0x18   :  { %v63_v53 = vor.u32 1.1754944e-38, %v62_v45  ;;  %vm61_vm7 = vcmp.eq.f32.partialorder %v60_v49, 8.507059e+37 }
  0x1b   :  { %v143_v38 = vpop.eup %142 }
  0x1c   :  { %v145_v39 = vpop.eup %144  ;;  %v78_v40 = vmul.f32 %v143_v38, %v75_v34  ;;  %vm83_vm1 = vweird.f32 %v143_v38 }
  0x1d   :  { %v52_v42 = vmul.f32 %v145_v39, %v50_v35  ;;  %vm57_vm3 = vweird.f32 %v145_v39  ;;  %vm84_vm4 = vmor %vm82_vm0, %vm83_vm1 }
  0x1e   :  { %v79_v46 = vsub.f32 1.0, %v78_v40  ;;  %vm58_vm5 = vmor %vm56_vm2, %vm57_vm3 }
  0x1f   :  { %v53_v48 = vsub.f32 1.0, %v52_v42 }
  0x20   :  { %v80_v50 = vmul.f32 %v143_v38, %v79_v46 }
  0x21   :  { %v54_v51 = vmul.f32 %v145_v39, %v53_v48 }
  0x22   :  { %v81_v55 = vadd.f32 %v143_v38, %v80_v50 }
  0x23   :  { %v55_v56 = vadd.f32 %v145_v39, %v54_v51 }
  0x24   :  { %v85_v58 = vsel %vm84_vm4, %v143_v38, %v81_v55 }
  0x25   :  { %v59_v59 = vsel %vm58_vm5, %v145_v39, %v55_v56  ;;  %v90_v60 = vsel %vm87_vm6, %v89_v52, %v85_v58 }
  0x26   :  { %v64_v61 = vsel %vm61_vm7, %v63_v53, %v59_v59  ;;  %v91_v62 = vmul.f32 %v90_v60, %v76_v54 }
  0x27   :  { %v65_v63 = vmul.f32 %v64_v61, %v47_v31 }
  0x29   :  { %v92_v0 = vsub.f32 %v65_v63, %v91_v62 }
  0x2b   :  { %v93_v3 = vsub.f32 1.0, %v92_v0 }
  0x2d   :  { %v106_v4 = vmul.f32 %v134_v2, %v93_v3 }
  0x2f   :  { %107 = vadd.xlane.f32.xlu0 %v106_v4 }
  0xa2   :  { %v108_v5 = vpop.xlane.xlu0 %107 }
  0xa3   :  { %v109_v6 = vrot.slane %v108_v5, 4 }
  0xa5   :  { %v110_v7 = vadd.f32 %v109_v6, %v108_v5 }
  0xa7   :  { %v111_v8 = vrot.slane %v110_v7, 2 }
  0xa9   :  { %v112_v9 = vadd.f32 %v111_v8, %v110_v7 }
  0xab   :  { %v113_v10 = vrot.slane %v112_v9, 1 }
  0xad   :  { %v114_v11 = vadd.f32 %v113_v10, %v112_v9 }
  0xaf   :  { %135 = vpush %v114_v11 }
  0xe0   :  { %s136_s15 = spop %135 }
  0xe1   :  { %117 = sst [smem:[#allocation5]] %s136_s15 }
  0xe2   :  { %126 = dma.smem_to_hbm %s190_s16, 16, %s124_s14, [#allocation4]  }
  0xe3   :  { %184 = dma.done.wait [#allocation4], 16  }
  0xe4   :  { %185 = vsyncadd [#allocation4], 4294967280 }
  0xe5   :  { %131 = sfence }
  0xe6   :  { %132 = vsyncpa [#allocation3], 1 }
  0xe7   :  { %133 = vsyncpa [#allocation4], 1 }

</bundles_post_ra>
